<compile_context>
chip_gen: v5e
topology: v5e:2x2
jax: 0.10.0
libtpu: 0.0.40
codegen_flags: <defaults>
</compile_context>

<pallas_src>
import jax
import jax.numpy as jnp
from jax.experimental import pallas as pl
from jax.experimental.pallas import tpu as pltpu

LANE = 128


def _round_up(x, m):
    return (x + m - 1) // m * m


def _default_block_t(T):
    # Keep the visual tile (dominant VMEM consumer) modest so 2x double-buffering plus the
    # resident weights/accumulator fits v5e's 16 MiB scoped-VMEM default and v7x's 64 MiB.
    for cand in (256, 128, 64, 32, 16):
        if cand <= T and T % cand == 0:
            return cand
    return T


# ----------------------------------------------------------------------------- kernel ----
def _fused_kernel(vis_ref, aud_ref,
                  w1v_ref, b1v_ref, w1a_ref, b1a_ref,
                  wv2_ref, bv2_ref, wa2_ref, ba2_ref,
                  out_ref, acc_ref):
    t = pl.program_id(1)
    nt = pl.num_programs(1)

    @pl.when(t == 0)
    def _init():
        acc_ref[...] = jnp.zeros_like(acc_ref)

    # Per-tile partial sum over the T segments (XLU sublane reduce), f32 accumulation.
    # The 1/T of the `mean` is folded into w1v, so this is a plain sum.
    acc_ref[...] += jnp.sum(vis_ref[...].astype(jnp.float32), axis=1)

    @pl.when(t == nt - 1)
    def _finalize():
        cdt = w1v_ref.dtype                                   # compute dtype (bf16 or f32)
        vis_sum = acc_ref[...].astype(cdt)                    # (TB, Dv)
        aud = aud_ref[...].astype(cdt)                        # (TB, Da)

        # Layer 1 (Linear + folded eval BatchNorm) + ReLU, one dot per branch (no zero blocks).
        h_v = jnp.dot(vis_sum, w1v_ref[...], preferred_element_type=jnp.float32) + b1v_ref[...]
        h_a = jnp.dot(aud, w1a_ref[...], preferred_element_type=jnp.float32) + b1a_ref[...]
        h_v = jnp.maximum(h_v, 0.0).astype(cdt)               # (TB, H)
        h_a = jnp.maximum(h_a, 0.0).astype(cdt)               # (TB, H)
        # Dropout(p=0.5) is identity in eval.

        # Layer 2 heads (padded to Cp lanes); multimodal head is a VPU add, not a matmul.
        o_v = jnp.dot(h_v, wv2_ref[...], preferred_element_type=jnp.float32) + bv2_ref[...]
        o_a = jnp.dot(h_a, wa2_ref[...], preferred_element_type=jnp.float32) + ba2_ref[...]
        o_m = 0.5 * (o_v + o_a)                               # trainable_composition=False

        # Single lane-dense, 128-aligned, unmasked 3*Cp-wide store.
        out_ref[...] = jnp.concatenate([o_v, o_a, o_m], axis=-1).astype(out_ref.dtype)


# --------------------------------------------------------------------------- packing ----
def pack_params(params, *, T, eps=1e-5, compute_dtype=jnp.bfloat16):
    """Fold eval-mode BatchNorm + 1/T into layer-1, pad layer-2 heads to 128 lanes.

    Call ONCE per parameter set (inference params are static) and reuse the result for
    every forward call.  Linear weights in `params` are stored (in, out).
    """
    f32 = jnp.float32
    H = params["wv1"].shape[1]
    C = params["wv2"].shape[1]
    Cp = _round_up(C, LANE)

    sv = params["gv"].astype(f32) * jax.lax.rsqrt(params["varv"].astype(f32) + eps)   # (1, H)
    sa = params["ga"].astype(f32) * jax.lax.rsqrt(params["vara"].astype(f32) + eps)   # (1, H)

    w1v = (params["wv1"].astype(f32) * sv) / jnp.asarray(T, f32)     # fold mean-over-T
    w1a = params["wa1"].astype(f32) * sa
    b1v = (params["bv1"].astype(f32) - params["mv"].astype(f32)) * sv + params["betav"].astype(f32)
    b1a = (params["ba1"].astype(f32) - params["ma"].astype(f32)) * sa + params["betaa"].astype(f32)

    wv2 = jnp.zeros((H, Cp), f32).at[:, :C].set(params["wv2"].astype(f32))
    wa2 = jnp.zeros((H, Cp), f32).at[:, :C].set(params["wa2"].astype(f32))
    bv2 = jnp.zeros((1, Cp), f32).at[:, :C].set(params["bv2"].astype(f32))
    ba2 = jnp.zeros((1, Cp), f32).at[:, :C].set(params["ba2"].astype(f32))

    return {
        # MXU operands in the compute dtype (bf16 halves weight DMA bytes / VMEM residency).
        "w1v": w1v.astype(compute_dtype), "w1a": w1a.astype(compute_dtype),
        "wv2": wv2.astype(compute_dtype), "wa2": wa2.astype(compute_dtype),
        # Biases stay f32: added after the f32-accumulated dot.
        "b1v": b1v, "b1a": b1a, "bv2": bv2, "ba2": ba2,
        "C": C, "Cp": Cp, "T": T, "compute_dtype": compute_dtype,
    }


# --------------------------------------------------------------------------- wrapper ----
def trailer_visual_audio_forward(visual_features, audio_features, packed, *,
                                 block_b=None, block_t=None, vmem_limit_bytes=None):
    """visual_features: (B, T, Dv); audio_features: (B, Da). `packed` from pack_params()."""
    B, T, Dv = visual_features.shape
    Da = audio_features.shape[-1]
    assert T == packed["T"], "pack_params was built for a different T"
    C, Cp = packed["C"], packed["Cp"]
    cdt = packed["compute_dtype"]

    if block_b is None:
        # TODO(synk): for production B, pick a multiple of 8 with B//block_b >= 2 so v7x's
        #             two TensorCores both get work on the "parallel" axis.
        block_b = B
    if block_t is None:
        block_t = _default_block_t(T)
    assert B % block_b == 0 and T % block_t == 0  # TODO(synk): ragged-edge masking

    nb, nt = B // block_b, T // block_t

    vis = visual_features.astype(cdt)
    aud = audio_features.astype(cdt)

    resident = lambda b, t: (0, 0)   # weights/biases: fetched once, resident across the grid
    compiler_kwargs = dict(dimension_semantics=("parallel", "arbitrary"))
    if vmem_limit_bytes is not None:   # e.g. raise on v5e (16 MiB scoped default) if needed
        compiler_kwargs["vmem_limit_bytes"] = vmem_limit_bytes

    out_slab = pl.pallas_call(
        _fused_kernel,
        out_shape=jax.ShapeDtypeStruct((B, 3 * Cp), jnp.float32),
        grid_spec=pltpu.PrefetchScalarGridSpec(
            num_scalar_prefetch=0,
            grid=(nb, nt),
            in_specs=[
                pl.BlockSpec((block_b, block_t, Dv), lambda b, t: (b, t, 0)),   # visual stream
                pl.BlockSpec((block_b, Da), lambda b, t: (b, 0)),               # audio (per-b)
                pl.BlockSpec(packed["w1v"].shape, resident),
                pl.BlockSpec(packed["b1v"].shape, resident),
                pl.BlockSpec(packed["w1a"].shape, resident),
                pl.BlockSpec(packed["b1a"].shape, resident),
                pl.BlockSpec(packed["wv2"].shape, resident),
                pl.BlockSpec(packed["bv2"].shape, resident),
                pl.BlockSpec(packed["wa2"].shape, resident),
                pl.BlockSpec(packed["ba2"].shape, resident),
            ],
            out_specs=pl.BlockSpec((block_b, 3 * Cp), lambda b, t: (b, 0)),
            scratch_shapes=[pltpu.VMEM((block_b, Dv), jnp.float32)],            # T-sum acc
        ),
        compiler_params=pltpu.CompilerParams(**compiler_kwargs),
    )(vis, aud,
      packed["w1v"], packed["b1v"], packed["w1a"], packed["b1a"],
      packed["wv2"], packed["bv2"], packed["wa2"], packed["ba2"])

    return {
        "visual_output": out_slab[:, :C],
        "audio_output": out_slab[:, Cp:Cp + C],
        "multimodal_output": out_slab[:, 2 * Cp:2 * Cp + C],
    }


# ----------------------------------------------------------------- params / reference ----
def init_params(key, visual_dim, audio_dim, hidden_dim, num_category):
    """Deterministic synthetic parameters. Linear weights stored as (in, out)."""
    ks = jax.random.split(key, 6)

    def lin(k, fan_in, fan_out):
        bound = 1.0 / jnp.sqrt(fan_in)
        kw, kb = jax.random.split(k)
        w = jax.random.uniform(kw, (fan_in, fan_out), jnp.float32, -bound, bound)
        b = jax.random.uniform(kb, (1, fan_out), jnp.float32, -bound, bound)
        return w, b

    wv1, bv1 = lin(ks[0], visual_dim, hidden_dim)
    wv2, bv2 = lin(ks[1], hidden_dim, num_category)
    wa1, ba1 = lin(ks[2], audio_dim, hidden_dim)
    wa2, ba2 = lin(ks[3], hidden_dim, num_category)

    def bn(k):
        kg, kb, km, kv = jax.random.split(k, 4)
        gamma = 1.0 + 0.1 * jax.random.normal(kg, (1, hidden_dim), jnp.float32)
        beta = 0.1 * jax.random.normal(kb, (1, hidden_dim), jnp.float32)
        mean = 0.2 * jax.random.normal(km, (1, hidden_dim), jnp.float32)
        var = jnp.abs(1.0 + 0.2 * jax.random.normal(kv, (1, hidden_dim), jnp.float32)) + 0.05
        return gamma, beta, mean, var

    gv, betav, mv, varv = bn(ks[4])
    ga, betaa, ma, vara = bn(ks[5])

    return {
        "wv1": wv1, "bv1": bv1, "gv": gv, "betav": betav, "mv": mv, "varv": varv,
        "wv2": wv2, "bv2": bv2,
        "wa1": wa1, "ba1": ba1, "ga": ga, "betaa": betaa, "ma": ma, "vara": vara,
        "wa2": wa2, "ba2": ba2,
    }


def reference_forward(vis, aud, params, eps=1e-5):
    """Plain-JAX f32 reference with full eval-mode BatchNorm (including eps)."""
    v = jnp.mean(vis, axis=1)
    hv = v @ params["wv1"] + params["bv1"]
    hv = (hv - params["mv"]) * jax.lax.rsqrt(params["varv"] + eps) * params["gv"] + params["betav"]
    hv = jnp.maximum(hv, 0.0)
    vo = hv @ params["wv2"] + params["bv2"]

    ha = aud @ params["wa1"] + params["ba1"]
    ha = (ha - params["ma"]) * jax.lax.rsqrt(params["vara"] + eps) * params["ga"] + params["betaa"]
    ha = jnp.maximum(ha, 0.0)
    ao = ha @ params["wa2"] + params["ba2"]

    mm = (vo + ao) / 2.0
    return vo, ao, mm


if __name__ == "__main__":
    # Small shapes consistent with the module's forward (concatenate='mean' over T segments).
    B, T = 2, 32         # batch, number of visual segments
    Dv, Da = 32, 32      # visual / audio feature dims
    H, C = 32, 21        # hidden dim, num_category

    key = jax.random.PRNGKey(0)
    k_vis, k_aud, k_par = jax.random.split(key, 3)

    visual_features = jax.random.normal(k_vis, (B, T, Dv), jnp.float32)
    audio_features = jax.random.normal(k_aud, (B, Da), jnp.float32)
    params = init_params(k_par, Dv, Da, H, C)

    vo, ao, mm = reference_forward(visual_features, audio_features, params)

    def max_err(x, y):
        return float(jnp.max(jnp.abs(x - y)))

    # 1) float32 compute path: exact-semantics validation of the fold/pack/grid pipeline.
    packed_f32 = pack_params(params, T=T, compute_dtype=jnp.float32)
    out_f32 = trailer_visual_audio_forward(
        visual_features, audio_features, packed_f32, block_b=B, block_t=16)
    jax.block_until_ready(out_f32)
    assert max_err(out_f32["visual_output"], vo) < 1e-4
    assert max_err(out_f32["audio_output"], ao) < 1e-4
    assert max_err(out_f32["multimodal_output"], mm) < 1e-4

    # 2) bfloat16 compute path (default / fast): MXU-native operands, f32 accumulation.
    packed_bf16 = pack_params(params, T=T)          # packed once, reused for every call
    out_bf16 = trailer_visual_audio_forward(
        visual_features, audio_features, packed_bf16, block_b=B, block_t=16)
    jax.block_until_ready(out_bf16)
    tol = 6e-2
    assert max_err(out_bf16["visual_output"], vo) < tol
    assert max_err(out_bf16["audio_output"], ao) < tol
    assert max_err(out_bf16["multimodal_output"], mm) < tol

    print("KERNEL_OK")
</pallas_src>

<mosaic_0001>
module attributes {stable_mosaic.version = 11 : i64} {
  func.func @_fused_kernel(%arg0: i32, %arg1: i32, %arg2: memref<2x16x32xf32, #tpu.memory_space<vmem>>, %arg3: memref<2x32xf32, #tpu.memory_space<vmem>>, %arg4: memref<32x32xf32, #tpu.memory_space<vmem>>, %arg5: memref<1x32xf32, #tpu.memory_space<vmem>>, %arg6: memref<32x32xf32, #tpu.memory_space<vmem>>, %arg7: memref<1x32xf32, #tpu.memory_space<vmem>>, %arg8: memref<32x128xf32, #tpu.memory_space<vmem>>, %arg9: memref<1x128xf32, #tpu.memory_space<vmem>>, %arg10: memref<32x128xf32, #tpu.memory_space<vmem>>, %arg11: memref<1x128xf32, #tpu.memory_space<vmem>>, %arg12: memref<2x384xf32, #tpu.memory_space<vmem>>, %arg13: memref<2x32xf32, #tpu.memory_space<vmem>>) attributes {dimension_semantics = [#tpu.dimension_semantics<parallel>, #tpu.dimension_semantics<arbitrary>], iteration_bounds = array<i64: 1, 2>, scalar_prefetch = 0 : i64, scratch_operands = 1 : i64, tpu.core_type = #tpu.core_type<tc>, window_params = [{transform_indices = @transform_0, window_bounds = array<i64: 2, 16, 32>}, {transform_indices = @transform_1, window_bounds = array<i64: 2, 32>}, {pipeline_mode = #tpu.pipeline_mode<synchronous>, transform_indices = @transform_2, window_bounds = array<i64: 32, 32>}, {pipeline_mode = #tpu.pipeline_mode<synchronous>, transform_indices = @transform_3, window_bounds = array<i64: 1, 32>}, {pipeline_mode = #tpu.pipeline_mode<synchronous>, transform_indices = @transform_4, window_bounds = array<i64: 32, 32>}, {pipeline_mode = #tpu.pipeline_mode<synchronous>, transform_indices = @transform_5, window_bounds = array<i64: 1, 32>}, {pipeline_mode = #tpu.pipeline_mode<synchronous>, transform_indices = @transform_6, window_bounds = array<i64: 32, 128>}, {pipeline_mode = #tpu.pipeline_mode<synchronous>, transform_indices = @transform_7, window_bounds = array<i64: 1, 128>}, {pipeline_mode = #tpu.pipeline_mode<synchronous>, transform_indices = @transform_8, window_bounds = array<i64: 32, 128>}, {pipeline_mode = #tpu.pipeline_mode<synchronous>, transform_indices = @transform_9, window_bounds = array<i64: 1, 128>}, {transform_indices = @transform_10, window_bounds = array<i64: 2, 384>}]} {
    %c0_i32 = arith.constant 0 : i32
    %0 = arith.cmpi eq, %arg1, %c0_i32 : i32
    %1 = arith.extui %0 : i1 to i32
    %c0_i32_0 = arith.constant 0 : i32
    %2 = arith.cmpi ne, %1, %c0_i32_0 : i32
    scf.if %2 {
      %cst_8 = arith.constant 0.000000e+00 : f32
      %11 = vector.broadcast %cst_8 : f32 to vector<2x32xf32>
      %c0_9 = arith.constant 0 : index
      %c0_10 = arith.constant 0 : index
      %12 = vector.load %arg13[%c0_9, %c0_10] : memref<2x32xf32, #tpu.memory_space<vmem>>, vector<2x32xf32>
      tpu.vector_store %arg13[%c0_9, %c0_10], %11 {strides = array<i32>} : memref<2x32xf32, #tpu.memory_space<vmem>>, vector<2x32xf32>,
    } else {
    }
    %c0 = arith.constant 0 : index
    %c0_1 = arith.constant 0 : index
    %3 = vector.load %arg13[%c0, %c0_1] : memref<2x32xf32, #tpu.memory_space<vmem>>, vector<2x32xf32>
    %c0_2 = arith.constant 0 : index
    %c0_3 = arith.constant 0 : index
    %c0_4 = arith.constant 0 : index
    %4 = vector.load %arg2[%c0_2, %c0_3, %c0_4] : memref<2x16x32xf32, #tpu.memory_space<vmem>>, vector<2x16x32xf32>
    %cst = arith.constant dense<0.000000e+00> : vector<2x32xf32>
    %5 = vector.multi_reduction <add>, %4, %cst [1] : vector<2x16x32xf32> to vector<2x32xf32>
    %6 = arith.addf %3, %5 : vector<2x32xf32>
    %c0_5 = arith.constant 0 : index
    %c0_6 = arith.constant 0 : index
    %7 = vector.load %arg13[%c0_5, %c0_6] : memref<2x32xf32, #tpu.memory_space<vmem>>, vector<2x32xf32>
    tpu.vector_store %arg13[%c0_5, %c0_6], %6 {strides = array<i32>} : memref<2x32xf32, #tpu.memory_space<vmem>>, vector<2x32xf32>,
    %c1_i32 = arith.constant 1 : i32
    %8 = arith.cmpi eq, %arg1, %c1_i32 : i32
    %9 = arith.extui %8 : i1 to i32
    %c0_i32_7 = arith.constant 0 : i32
    %10 = arith.cmpi ne, %9, %c0_i32_7 : i32
    scf.if %10 {
      %c0_8 = arith.constant 0 : index
      %c0_9 = arith.constant 0 : index
      %11 = vector.load %arg13[%c0_8, %c0_9] : memref<2x32xf32, #tpu.memory_space<vmem>>, vector<2x32xf32>
      %c0_10 = arith.constant 0 : index
      %c0_11 = arith.constant 0 : index
      %12 = vector.load %arg3[%c0_10, %c0_11] : memref<2x32xf32, #tpu.memory_space<vmem>>, vector<2x32xf32>
      %c0_12 = arith.constant 0 : index
      %c0_13 = arith.constant 0 : index
      %13 = vector.load %arg4[%c0_12, %c0_13] : memref<32x32xf32, #tpu.memory_space<vmem>>, vector<32x32xf32>
      %cst_14 = arith.constant dense<0.000000e+00> : vector<2x32xf32>
      %14 = tpu.matmul %11, %13, %cst_14 {dimension_numbers = #tpu.dot_dimension_numbers<[1], [0], [0], [1], [0, 0, 1, 1], [], []>} : vector<2x32xf32>, vector<32x32xf32>, vector<2x32xf32> -> vector<2x32xf32>
      %c0_15 = arith.constant 0 : index
      %c0_16 = arith.constant 0 : index
      %15 = vector.load %arg5[%c0_15, %c0_16] : memref<1x32xf32, #tpu.memory_space<vmem>>, vector<1x32xf32>
      %16 = vector.broadcast %15 : vector<1x32xf32> to vector<2x32xf32>
      %17 = arith.addf %14, %16 : vector<2x32xf32>
      %c0_17 = arith.constant 0 : index
      %c0_18 = arith.constant 0 : index
      %18 = vector.load %arg6[%c0_17, %c0_18] : memref<32x32xf32, #tpu.memory_space<vmem>>, vector<32x32xf32>
      %cst_19 = arith.constant dense<0.000000e+00> : vector<2x32xf32>
      %19 = tpu.matmul %12, %18, %cst_19 {dimension_numbers = #tpu.dot_dimension_numbers<[1], [0], [0], [1], [0, 0, 1, 1], [], []>} : vector<2x32xf32>, vector<32x32xf32>, vector<2x32xf32> -> vector<2x32xf32>
      %c0_20 = arith.constant 0 : index
      %c0_21 = arith.constant 0 : index
      %20 = vector.load %arg7[%c0_20, %c0_21] : memref<1x32xf32, #tpu.memory_space<vmem>>, vector<1x32xf32>
      %21 = vector.broadcast %20 : vector<1x32xf32> to vector<2x32xf32>
      %22 = arith.addf %19, %21 : vector<2x32xf32>
      %cst_22 = arith.constant 0.000000e+00 : f32
      %23 = vector.broadcast %cst_22 : f32 to vector<2x32xf32>
      %24 = arith.maximumf %17, %23 : vector<2x32xf32>
      %cst_23 = arith.constant 0.000000e+00 : f32
      %25 = vector.broadcast %cst_23 : f32 to vector<2x32xf32>
      %26 = arith.maximumf %22, %25 : vector<2x32xf32>
      %c0_24 = arith.constant 0 : index
      %c0_25 = arith.constant 0 : index
      %27 = vector.load %arg8[%c0_24, %c0_25] : memref<32x128xf32, #tpu.memory_space<vmem>>, vector<32x128xf32>
      %cst_26 = arith.constant dense<0.000000e+00> : vector<2x128xf32>
      %28 = tpu.matmul %24, %27, %cst_26 {dimension_numbers = #tpu.dot_dimension_numbers<[1], [0], [0], [1], [0, 0, 1, 1], [], []>} : vector<2x32xf32>, vector<32x128xf32>, vector<2x128xf32> -> vector<2x128xf32>
      %c0_27 = arith.constant 0 : index
      %c0_28 = arith.constant 0 : index
      %29 = vector.load %arg9[%c0_27, %c0_28] : memref<1x128xf32, #tpu.memory_space<vmem>>, vector<1x128xf32>
      %30 = vector.broadcast %29 : vector<1x128xf32> to vector<2x128xf32>
      %31 = arith.addf %28, %30 : vector<2x128xf32>
      %c0_29 = arith.constant 0 : index
      %c0_30 = arith.constant 0 : index
      %32 = vector.load %arg10[%c0_29, %c0_30] : memref<32x128xf32, #tpu.memory_space<vmem>>, vector<32x128xf32>
      %cst_31 = arith.constant dense<0.000000e+00> : vector<2x128xf32>
      %33 = tpu.matmul %26, %32, %cst_31 {dimension_numbers = #tpu.dot_dimension_numbers<[1], [0], [0], [1], [0, 0, 1, 1], [], []>} : vector<2x32xf32>, vector<32x128xf32>, vector<2x128xf32> -> vector<2x128xf32>
      %c0_32 = arith.constant 0 : index
      %c0_33 = arith.constant 0 : index
      %34 = vector.load %arg11[%c0_32, %c0_33] : memref<1x128xf32, #tpu.memory_space<vmem>>, vector<1x128xf32>
      %35 = vector.broadcast %34 : vector<1x128xf32> to vector<2x128xf32>
      %36 = arith.addf %33, %35 : vector<2x128xf32>
      %37 = arith.addf %31, %36 : vector<2x128xf32>
      %cst_34 = arith.constant 5.000000e-01 : f32
      %38 = vector.broadcast %cst_34 : f32 to vector<2x128xf32>
      %39 = arith.mulf %38, %37 : vector<2x128xf32>
      %40 = tpu.concatenate %31, %36, %39 in 1 : vector<2x128xf32>, vector<2x128xf32>, vector<2x128xf32> -> vector<2x384xf32>
      %c0_35 = arith.constant 0 : index
      %c0_36 = arith.constant 0 : index
      %41 = vector.load %arg12[%c0_35, %c0_36] : memref<2x384xf32, #tpu.memory_space<vmem>>, vector<2x384xf32>
      tpu.vector_store %arg12[%c0_35, %c0_36], %40 {strides = array<i32>} : memref<2x384xf32, #tpu.memory_space<vmem>>, vector<2x384xf32>,
    } else {
    }
    return
  }
  func.func @transform_0(%arg0: i32, %arg1: i32) -> (i32, i32, i32) {
    %c0_i32 = arith.constant 0 : i32
    %c0_i32_0 = arith.constant 0 : i32
    return %arg0, %arg1, %c0_i32 : i32, i32, i32
  }
  func.func @transform_1(%arg0: i32, %arg1: i32) -> (i32, i32) {
    %c0_i32 = arith.constant 0 : i32
    %c0_i32_0 = arith.constant 0 : i32
    return %arg0, %c0_i32 : i32, i32
  }
  func.func @transform_2(%arg0: i32, %arg1: i32) -> (i32, i32) {
    %c0_i32 = arith.constant 0 : i32
    %c0_i32_0 = arith.constant 0 : i32
    %c0_i32_1 = arith.constant 0 : i32
    return %c0_i32, %c0_i32_0 : i32, i32
  }
  func.func @transform_3(%arg0: i32, %arg1: i32) -> (i32, i32) {
    %c0_i32 = arith.constant 0 : i32
    %c0_i32_0 = arith.constant 0 : i32
    %c0_i32_1 = arith.constant 0 : i32
    return %c0_i32, %c0_i32_0 : i32, i32
  }
  func.func @transform_4(%arg0: i32, %arg1: i32) -> (i32, i32) {
    %c0_i32 = arith.constant 0 : i32
    %c0_i32_0 = arith.constant 0 : i32
    %c0_i32_1 = arith.constant 0 : i32
    return %c0_i32, %c0_i32_0 : i32, i32
  }
  func.func @transform_5(%arg0: i32, %arg1: i32) -> (i32, i32) {
    %c0_i32 = arith.constant 0 : i32
    %c0_i32_0 = arith.constant 0 : i32
    %c0_i32_1 = arith.constant 0 : i32
    return %c0_i32, %c0_i32_0 : i32, i32
  }
  func.func @transform_6(%arg0: i32, %arg1: i32) -> (i32, i32) {
    %c0_i32 = arith.constant 0 : i32
    %c0_i32_0 = arith.constant 0 : i32
    %c0_i32_1 = arith.constant 0 : i32
    return %c0_i32, %c0_i32_0 : i32, i32
  }
  func.func @transform_7(%arg0: i32, %arg1: i32) -> (i32, i32) {
    %c0_i32 = arith.constant 0 : i32
    %c0_i32_0 = arith.constant 0 : i32
    %c0_i32_1 = arith.constant 0 : i32
    return %c0_i32, %c0_i32_0 : i32, i32
  }
  func.func @transform_8(%arg0: i32, %arg1: i32) -> (i32, i32) {
    %c0_i32 = arith.constant 0 : i32
    %c0_i32_0 = arith.constant 0 : i32
    %c0_i32_1 = arith.constant 0 : i32
    return %c0_i32, %c0_i32_0 : i32, i32
  }
  func.func @transform_9(%arg0: i32, %arg1: i32) -> (i32, i32) {
    %c0_i32 = arith.constant 0 : i32
    %c0_i32_0 = arith.constant 0 : i32
    %c0_i32_1 = arith.constant 0 : i32
    return %c0_i32, %c0_i32_0 : i32, i32
  }
  func.func @transform_10(%arg0: i32, %arg1: i32) -> (i32, i32) {
    %c0_i32 = arith.constant 0 : i32
    %c0_i32_0 = arith.constant 0 : i32
    return %arg0, %c0_i32 : i32, i32
  }
}

</mosaic_0001>

<bundles_post_ra>
// kernel: tpu_custom_call.1
= control target key start
LH: loop header
LB: loop body
LE: loop exit
PB: predicated region body
PF: predicated region fallthrough
CT: control target
= control target key end

     0   :  { %s1472_s0 = inlined_call_operand.hbm [shape: f32[2,32,32], index: 0, kind: input, shape index: {}]   ;;  %s1473_s1 = inlined_call_operand.hbm [shape: f32[2,32], index: 1, kind: input, shape index: {}]   ;;  %s1474_s2 = inlined_call_operand.hbm [shape: f32[32,32], index: 2, kind: input, shape index: {}]   ;;  %s1475_s3 = inlined_call_operand.vmem [shape: f32[1,32], index: 3, kind: input, shape index: {}]   ;;  %s1476_s4 = inlined_call_operand.hbm [shape: f32[32,32], index: 4, kind: input, shape index: {}]   ;;  %s1477_s5 = inlined_call_operand.vmem [shape: f32[1,32], index: 5, kind: input, shape index: {}]   ;;  %s1478_s6 = inlined_call_operand.hbm [shape: f32[32,128], index: 6, kind: input, shape index: {}]   ;;  %s1479_s7 = inlined_call_operand.vmem [shape: f32[1,128], index: 7, kind: input, shape index: {}]   ;;  %s1480_s8 = inlined_call_operand.hbm [shape: f32[32,128], index: 8, kind: input, shape index: {}]   ;;  %s1481_s9 = inlined_call_operand.vmem [shape: f32[1,128], index: 9, kind: input, shape index: {}]   ;;  %s1482_s10 = inlined_call_operand.hbm [shape: f32[2,384], index: 10, kind: output, shape index: {}]  }
   0x1   :  { %1485 = sst [smem:[#allocation25_spill]] %s1473_s1 }
   0x2   :  { %1486 = sst [smem:[#allocation26_spill]] %s1474_s2 }
   0x3   :  { %1487 = sst [smem:[#allocation27_spill]] %s1476_s4 }
   0x4   :  { %1488 = sst [smem:[#allocation28_spill]] %s1481_s9 }
   0x5   :  { %1489 = sst [smem:[#allocation29_spill]] %s1482_s10 }
   0x6   :  { %15 = vsyncpa [#allocation4], 0 }
   0x7   :  { %17 = vsyncpa [#allocation4 + $0x1], 0 }
   0x8   :  { %18 = vsyncpa [#allocation7], 0 }
   0x9   :  { %19 = vsyncpa [#allocation10], 0 }
   0xa   :  { %20 = vsyncpa [#allocation13], 0 }
   0xb   :  { %21 = vsyncpa [#allocation5], 0  ;;  %s1289_s13 = smov 0   ;;  %s1291_s14 = smov 0  }
   0xc   :  { %s1293_s15 = smov 0   ;;  %s1295_s16 = smov 0  }
   0xd   :  { %s1297_s17 = smov 0   ;;  %s1299_s18 = smov 0  }
   0xe LB: > { %s1483_s19 = sadd.s32 4294967295, %s1217_s18   ;;  %s36_s20 = sadd.s32 1, %s1213_s17  ;;  %s1217_s18 = sphi %s1299_s18, %s27_s18   ;;  %s1213_s17 = sphi %s1297_s17, %s1509_s17   ;;  %s1209_s16 = sphi %s1295_s16, %s1508_s16   ;;  %s1205_s15 = sphi %s1293_s15, %s1507_s15   ;;  %s1201_s14 = sphi %s1291_s14, %s1506_s14   ;;  %s1197_s13 = sphi %s1289_s13, %s1505_s13  }
   0xf   : > { %p37_p0 = scmp.ge.s32.totalorder %s36_s20, 2  ;;  %s48_s21 = sadd.s32 1, %s1205_s15 }
  0x10   : > { %p55_p1 = scmp.ne.s32.totalorder %s1205_s15, %s1201_s14  ;;  %p56_p2 = scmp.eq.s32.totalorder %s1217_s18, 0 }
  0x11   : > { %s1511_s20 = smov (%p37_p0, %s36_s20), 0  ;;  %p61_p4 = scmp.ne.s32.totalorder %s1201_s14, %s1197_s13 }
  0x12   : > { %1490 = sst [smem:[#allocation23_spill]] %s1511_s20  ;;  %p1325_p3 = por %p56_p2, %p55_p1 }
  0x13   : > { %s44_s23 = ssub.s32 %s1213_s17, %s1511_s20  ;;  %p1334_p5 = scmp.eq.s32.totalorder %s1483_s19, 0 }
  0x14   : > { %p46_p6 = scmp.eq.s32.totalorder %s44_s23, 0  ;;  %p815_p7 = scmp.ge.s32.totalorder %s1217_s18, 1 }
  0x15   : > { %p1341_p8 = por %p1334_p5, %p61_p4  ;;  %p292_p9 = scmp.lt.s32.totalorder %s1217_s18, 3 }
  0x16   : > { %s1347_s26 = scalar_select %p46_p6, %s1205_s15, %s48_s21  }
  0x17   : > { %p1349_p10 = pnand %p815_p7, %p292_p9  ;;  %s1496_s1 = sld [smem:[#allocation25_spill]] }
  0x18   : > { %1494 = sst [smem:[#allocation24_spill]] %s1347_s26  ;;  %s1219_s11 = smov [#allocation6]  }
  0x19   : > { %p878_p11 = pneg %p1349_p10  ;;  %s308_s12 = sshll.u32 %s1219_s11, 4  ;;  %s309_s12 = int_to_ptr.vmem [resolvable:$true] %s308_s12 }
  0x1a   : > { %s1498_s4 = sld [smem:[#allocation27_spill]]  ;;  %s1221_s26 = smov 128  }
  0x1b   : > { %p1360_p12 = pnand %p878_p11, %p1334_p5  ;;  %s1499_s2 = sld [smem:[#allocation26_spill]] }
  0x1c   : > { %s1222_s10 = smov 8   ;;  %s1223_s21 = smov [#allocation8]  }
  0x1d   : > { %s306_s30 = sshll.u32 %s1496_s1, 4  ;;  %s1220_s1 = smov [#allocation9]   ;;  %s307_s30 = int_to_ptr.hbm [resolvable:$true] %s306_s30 }
  0x1e   : > { %881 = dma.hbm_to_vmem [thread:$0]  (!%p1360_p12), %s307_s30, 32, %s309_s12, [#allocation7]  }
  0x1f   : > { %s336_s20 = sshll.u32 %s1220_s1, 4  ;;  %s319_s23 = sshll.u32 %s1223_s21, 4  ;;  %s337_s20 = int_to_ptr.vmem [resolvable:$true] %s336_s20  ;;  %s320_s23 = int_to_ptr.vmem [resolvable:$true] %s319_s23 }
  0x20   : > { %s334_s19 = sshll.u32 %s1498_s4, 4  ;;  %s351_s30 = sshll.u32 %s1478_s6, 4  ;;  %s335_s19 = int_to_ptr.hbm [resolvable:$true] %s334_s19  ;;  %s352_s30 = int_to_ptr.hbm [resolvable:$true] %s351_s30 }
  0x21   : > { %s317_s11 = sshll.u32 %s1499_s2, 4  ;;  %s368_s28 = sshll.u32 %s1480_s8, 4  ;;  %s318_s11 = int_to_ptr.hbm [resolvable:$true] %s317_s11  ;;  %s369_s28 = int_to_ptr.hbm [resolvable:$true] %s368_s28 }
  0x22   : > { %887 = dma.hbm_to_vmem [thread:$0]  (!%p1360_p12), %s335_s19, 512, %s337_s20, [#allocation10], %s1221_s26, %s1221_s26, %s1222_s10  }
  0x23   : > { %884 = dma.hbm_to_vmem [thread:$0]  (!%p1360_p12), %s318_s11, 512, %s320_s23, [#allocation7], %s1221_s26, %s1221_s26, %s1222_s10  }
  0x24   : > { %s1224_s29 = smov [#allocation11]   ;;  %s1225_s19 = smov [#allocation12]  }
  0x25   : > { %s353_s2 = sshll.u32 %s1224_s29, 4  ;;  %s370_s20 = sshll.u32 %s1225_s19, 4  ;;  %s354_s2 = int_to_ptr.vmem [resolvable:$true] %s353_s2  ;;  %s371_s20 = int_to_ptr.vmem [resolvable:$true] %s370_s20 }
  0x26   : > { %890 = dma.hbm_to_vmem [thread:$0]  (!%p1360_p12), %s352_s30, 512, %s354_s2, [#allocation10], %s1221_s26, %s1221_s26, %s1222_s10  }
  0x27   : > { %893 = dma.hbm_to_vmem [thread:$0]  (!%p1360_p12), %s369_s28, 512, %s371_s20, [#allocation13], %s1221_s26, %s1221_s26, %s1222_s10  }
  0x28   : > { %p821_p13 = scmp.ge.s32.totalorder %s1217_s18, 2 }
  0x2a   : > { %383 = sbr.rel (%p821_p13) target bundleno = 61 (0x3d), region = 52 }
  0x2f   : > { %s387_s4 = sand.u32 1, %s1205_s15   ;;  %s844_s9 = sshll.u32 %s1213_s17, 4 }
  0x30   : > { %s822_s11 = sshll.u32 %s387_s4, 5  ;;  %s399_s2 = scalar_lea.hbm %s1472_s0, %s844_s9 }
  0x31   : > { %s855_s13 = scalar_select %p1325_p3, [#allocation0], [#allocation17] }
  0x32   : > { %s412_s10 = sshll.u32 %s399_s2, 4  ;;  %s391_s26 = scalar_lea.vmem [#allocation3], %s822_s11  ;;  %s413_s10 = int_to_ptr.hbm [resolvable:$true] %s412_s10 }
  0x33   : > { %s414_s30 = sshll.u32 %s391_s26, 4  ;;  %s404_s12 = sld [smem:[%s855_s13]]   ;;  %s415_s30 = int_to_ptr.vmem [resolvable:$true] %s414_s30 }
  0x34   : > { %s1226_s1 = smov 512   ;;  %s1227_s28 = smov 256  }
  0x35   : > { %856 = sst [smem:[#allocation16]] (%p1325_p3), %s1226_s1  ;;  %s1228_s29 = smov 2  }
  0x36   : > { %857 = sst [smem:[#allocation16 + $0x1]] (%p1325_p3), %s1227_s28  ;;  %s1229_s19 = smov 128  }
  0x37   : > { %858 = sst [smem:[#allocation16 + $0x2]] (%p1325_p3), %s1228_s29  ;;  %s1230_s11 = smov 8  }
  0x38   : > { %859 = sst [smem:[#allocation16 + $0x3]] (%p1325_p3), %s1229_s19  ;;  %s388_s21 = scalar_lea.sflag [#allocation4], %s387_s4 }
  0x39   : > { %s825_s20 = sshll.u32 %s404_s12, 26  ;;  %860 = sst [smem:[#allocation16 + $0x4]] (%p1325_p3), %s1229_s19 }
  0x3a   : > { %s826_s9 = sadd.s32 134217728, %s825_s20  ;;  %861 = sst [smem:[#allocation16 + $0x5]] (%p1325_p3), %s1230_s11 }
  0x3b   : > { %s1231_s23 = smov [#allocation15]  }
  0x3c   : > { %862 = dma.general (%p1325_p3), %s413_s10, 512, %s415_s30, %s388_s21, %s1231_s23, [#allocation16], %s826_s9, 0  }
  0x3d PF: > { %439 = sbr.rel (%p1349_p10) target bundleno = 394 (0x18a), region = 60  ;;  %s441_s2 = sand.u32 (!%p1349_p10), 1, %s1201_s14  }
  0x3e   : > { %s828_s13 = sshll.u32 (!%p1349_p10), %s441_s2, 5  ;;  %s442_s26 = scalar_lea.sflag (!%p1349_p10), [#allocation4], %s441_s2 }
  0x3f   : > { %s445_s12 = scalar_lea.vmem (!%p1349_p10), [#allocation3], %s828_s13 }
  0x42   : > { %1176 = dma.done.wait (%p1341_p8), %s442_s26, 512  }
  0x43   : > { %1178 = vsyncadd (%p1341_p8), %s442_s26, 4294966784 }
  0x44   : > { %1180 = dma.done.wait (%p1334_p5), [#allocation7], 544  }
  0x45   : > { %1182 = vsyncadd (%p1334_p5), [#allocation7], 4294966752 }
  0x46   : > { %1184 = dma.done.wait (%p1334_p5), [#allocation10], 1024  }
  0x47   : > { %1186 = vsyncadd (%p1334_p5), [#allocation10], 4294966272 }
  0x48   : > { %1188 = dma.done.wait (%p1334_p5), [#allocation13], 512  }
  0x49   : > { %1190 = vsyncadd (%p1334_p5), [#allocation13], 4294966784  ;;  %p834_p0 = scmp.ne.s32.totalorder %s1209_s16, 0 }
  0x4b   : > { %508 = sbr.rel (%p834_p0) target bundleno = 82 (0x52), region = 88 }
  0x50   : > { %vm509_vm0 = vcmask 254976   ;;  %v1232_v0 = vmov 0.0  }
  0x51   : > { %510 = vst.msk [vmem:[#allocation2] sm:$0x3] %vm509_vm0, %v1232_v0 }
  0x52 PF: > { %v512_v1 = vld [vmem:[%s445_s12] sm:$0xff]  ;;  %v513_v2 = vld [vmem:[%s445_s12 + $0x8] sm:$0xff]  ;;  %vm516_vm1 = vcmask 261120   ;;  %v514_v3 = vld [vmem:[%s445_s12 + $0x10] sm:$0xff]  ;;  %vm537_vm2 = vcmask 1041409   ;;  %vm541_vm3 = vcmask 254976  }
  0x53   : > { %v515_v4 = vld [vmem:[%s445_s12 + $0x18] sm:$0xff]  ;;  %v517_v5 = vsel %vm516_vm1, %v512_v1, 0.0  ;;  %v518_v6 = vsel %vm516_vm1, %v513_v2, 0.0  ;;  %v526_v8 = vsel %vm516_vm1, %v514_v3, 0.0  ;;  %p835_p1 = scmp.ne.s32.totalorder %s1209_s16, 1 }
  0x54   : > { %v519_v7 = vadd.f32 %v518_v6, %v517_v5  ;;  %v527_v9 = vsel %vm516_vm1, %v515_v4, 0.0  ;;  %s1500_s1 = sld [smem:[#allocation28_spill]] (!%p835_p1) }
  0x55   : > { %v528_v10 = vadd.f32 %v527_v9, %v526_v8 }
  0x56   : > { %v520_v11 = vrot.slane %v519_v7, 4 }
  0x57   : > { %v529_v12 = vrot.slane %v528_v10, 4 }
  0x58   : > { %v521_v13 = vadd.f32 %v520_v11, %v519_v7  ;;  %v511_v22 = vld [vmem:[#allocation2] sm:$0x3] }
  0x59   : > { %v530_v14 = vadd.f32 %v529_v12, %v528_v10 }
  0x5a   : > { %v522_v15 = vrot.slane %v521_v13, 2 }
  0x5b   : > { %v531_v16 = vrot.slane %v530_v14, 2 }
  0x5c   : > { %v523_v17 = vadd.f32 %v522_v15, %v521_v13 }
  0x5d   : > { %v532_v18 = vadd.f32 %v531_v16, %v530_v14 }
  0x5e   : > { %v524_v19 = vrot.slane %v523_v17, 1 }
  0x5f   : > { %v533_v20 = vrot.slane %v532_v18, 1 }
  0x60   : > { %v525_v21 = vadd.f32 %v524_v19, %v523_v17 }
  0x61   : > { %v534_v23 = vadd.f32 %v533_v20, %v532_v18 }
  0x62   : > { %546 = sbr.rel (%p835_p1) target bundleno = 384 (0x180), region = 92 }
  0x63   : > { %v538_v24 = vsel %vm537_vm2, %v534_v23, %v525_v21 }
  0x64   : > { %v540_v25 = vadd.f32 %v538_v24, %v511_v22 }
  0x66   : > { %542 = vst.msk [vmem:[#allocation2] sm:$0x3] %vm541_vm3, %v540_v25 }
  0x67   : > { %v552_v26 = vld [vmem:[#allocation8 + $0x18] sm:$0xff]  ;;  %v551_v28 = vld [vmem:[#allocation8 + $0x10] sm:$0xff]  ;;  %v550_v30 = vld [vmem:[#allocation8 + $0x8] sm:$0xff]  ;;  %vm682_vm4 = vcmask 1041408   ;;  %vm684_vm5 = vcmask 1043456  }
  0x68   : > { %v583_v27 = vld [vmem:[#allocation9 + $0x18] sm:$0xff]  ;;  %572 = vmatpush.msra.mxu0 %v552_v26  ;;  %v582_v29 = vld [vmem:[#allocation9 + $0x10] sm:$0xff]  ;;  %v581_v31 = vld [vmem:[#allocation9 + $0x8] sm:$0xff] }
  0x69   : > { %603 = vmatpush.msra.mxu1 %v583_v27  ;;  %v549_v32 = vld [vmem:[#allocation8] sm:$0xff]  ;;  %v616_v34 = vld [vmem:[#allocation11 + $0x18] sm:$0xff]  ;;  %v615_v38 = vld [vmem:[#allocation11 + $0x10] sm:$0xff] }
  0x6a   : > { %573 = vmatpush.msra.mxu0 %v551_v28  ;;  %v580_v33 = vld [vmem:[#allocation9] sm:$0xff]  ;;  %v647_v35 = vld [vmem:[#allocation12 + $0x18] sm:$0xff]  ;;  %636 = vmatpush.msra.mxu2 %v616_v34  ;;  %v646_v39 = vld [vmem:[#allocation12 + $0x10] sm:$0xff] }
  0x6b   : > { %604 = vmatpush.msra.mxu1 %v582_v29  ;;  %667 = vmatpush.msra.mxu3 %v647_v35  ;;  %v548_v37 = vld [vmem:[#allocation6] sm:$0x3]  ;;  %v614_v40 = vld [vmem:[#allocation11 + $0x8] sm:$0xff]  ;;  %v613_v42 = vld [vmem:[#allocation11] sm:$0xff] }
  0x6c   : > { %574 = vmatpush.msra.mxu0 %v550_v30  ;;  %637 = vmatpush.msra.mxu2 %v615_v38  ;;  %v645_v41 = vld [vmem:[#allocation12 + $0x8] sm:$0xff]  ;;  %v644_v43 = vld [vmem:[#allocation12] sm:$0xff]  ;;  %v969_v44 = vld [vmem:[%s1475_s3] ss:$0 sm:$0xff] }
  0x6d   : > { %v547_v36 = vld [vmem:[#allocation2] sm:$0x3]  ;;  %605 = vmatpush.msra.mxu1 %v581_v31  ;;  %668 = vmatpush.msra.mxu3 %v646_v39 }
  0x6e   : > { %575 = vmatpush.msra.mxu0 %v549_v32  ;;  %638 = vmatpush.msra.mxu2 %v614_v40  ;;  %v970_v45 = vld [vmem:[%s1477_s5] ss:$0 sm:$0xff] }
  0x6f   : > { %606 = vmatpush.msra.mxu1 %v580_v33  ;;  %836 = vmatmul.msk.f32.vlgmr.msra.gmra.mxu0 %vm516_vm1, %v547_v36  ;;  %v971_v52 = vld [vmem:[%s1479_s7] ss:$0 sm:$0xff] }
  0x70   : > { %837 = vmatmul.msk.f32.vlgmr.msra.gmra.mxu1 %vm516_vm1, %v548_v37  ;;  %669 = vmatpush.msra.mxu3 %v645_v41  ;;  %v972_v53 = vld [vmem:[%s1500_s1] ss:$0 sm:$0xff] }
  0x71   : > { %639 = vmatpush.msra.mxu2 %v613_v42 }
  0x72   : > { %670 = vmatpush.msra.mxu3 %v644_v43 }
  0xec   : > { %v577_v46 = vpop.f32.mrf.mxu0 }
  0xed   : > { %v608_v47 = vpop.f32.mrf.mxu1  ;;  %v578_v48 = vadd.f32 %v969_v44, %v577_v46 }
  0xee   : > { %v609_v49 = vadd.f32 %v970_v45, %v608_v47 }
  0xef   : > { %v611_v50 = vmax.f32 %v578_v48, 0.0 }
  0xf0   : > { %v612_v51 = vmax.f32 %v609_v49, 0.0 }
  0xf1   : > { %838 = vmatmul.msk.f32.vlgmr.msra.gmra.mxu2 %vm516_vm1, %v611_v50 }
  0xf2   : > { %839 = vmatmul.msk.f32.vlgmr.msra.gmra.mxu3 %vm516_vm1, %v612_v51 }
 0x174   : > { %v641_v54 = vpop.f32.mrf.mxu2 }
 0x175   : > { %v672_v55 = vpop.f32.mrf.mxu3  ;;  %v642_v56 = vadd.f32 %v971_v52, %v641_v54 }
 0x176   : > { %v673_v57 = vadd.f32 %v972_v53, %v672_v55 }
 0x178   : > { %v675_v58 = vadd.f32 %v673_v57, %v642_v56  ;;  %v680_v59 = vrot.slane %v673_v57, 6 }
 0x17a   : > { %v676_v60 = vmul.f32 0.5, %v675_v58  ;;  %v683_v62 = vsel %vm682_vm4, %v642_v56, %v680_v59 }
 0x17c   : > { %v681_v61 = vrot.slane %v676_v60, 4 }
 0x17e   : > { %v685_v63 = vsel %vm684_vm5, %v683_v62, %v681_v61 }
 0x17f   : > { %687 = vst [vmem:[#allocation14] sm:$0x3f] %v685_v63 }
 0x180 PF: > { %s1501_s28 = sadd.s32 4294967295, %s1217_s18   ;;  %s1502_s20 = sld [smem:[#allocation29_spill]] }
 0x181   : > { %p904_p2 = scmp.eq.s32.totalorder %s1501_s28, 1  ;;  %s1233_s11 = smov [#allocation14]  }
 0x182   : > { %s697_s21 = sshll.u32 %s1233_s11, 4  ;;  %s698_s21 = int_to_ptr.vmem [resolvable:$true] %s697_s21 }
 0x186   : > { %s699_s9 = sshll.u32 %s1502_s20, 4  ;;  %s700_s9 = int_to_ptr.hbm [resolvable:$true] %s699_s9 }
 0x187   : > { %875 = dma.vmem_to_hbm [thread:$0]  (%p904_p2), %s698_s21, 96, %s700_s9, [#allocation5]  }
 0x188   : > { %1192 = dma.done.wait (%p904_p2), [#allocation5], 96  }
 0x189   : > { %1194 = vsyncadd (%p904_p2), [#allocation5], 4294967200 }
 0x18a PF: > { %s27_s18 = sadd.s32 1, %s1217_s18   ;;  %s1503_s23 = sld [smem:[#allocation24_spill]] }
 0x18b   : > { %p24_p3 = scmp.ge.s32.totalorder %s27_s18, 4   ;;  %s1504_s2 = sld [smem:[#allocation23_spill]] }
 0x18c   : > { %s1505_s13 = smov %s1201_s14  ;;  %s1506_s14 = smov %s1205_s15 }
 0x18d   : > { %s1508_s16 = smov %s1213_s17  ;;  %26 = sbr.rel (!%p24_p3) target bundleno = 14 (0xe), region = 132 }
 0x190   : > { %s1507_s15 = smov %s1503_s23 }
 0x191   : > { %s1509_s17 = smov %s1504_s2 }
 0x192   :  { %713 = vsyncpa [#allocation4], 1 }
 0x193   :  { %715 = vsyncpa [#allocation4 + $0x1], 1 }
 0x194   :  { %716 = vsyncpa [#allocation7], 1 }
 0x195   :  { %717 = vsyncpa [#allocation10], 1 }
 0x196   :  { %718 = vsyncpa [#allocation13], 1 }
 0x197   :  { %719 = vsyncpa [#allocation5], 1 }
 0x198   :  { %721 = vsyncpa [#allocation5 + $0x1], 1 }

</bundles_post_ra>
